<compile_context>
chip_gen: v6e
topology: v6e:2x2x1
jax: 0.10.0
libtpu: 0.0.40
codegen_flags: <defaults>
</compile_context>

<pallas_src>
import jax
import jax.numpy as jnp
from jax.experimental import pallas as pl
from jax.experimental.pallas import tpu as pltpu

_LANES = 128
_DEFAULT_BLOCK_BYTES = 4 * 1024 * 1024   # ~4 MiB per policy input per buffer
_VMEM_LIMIT_BYTES = 32 * 1024 * 1024     # safe on v5e/v6e (128 MiB phys) and v7x (64 MiB phys)


def _sublane_multiple(dtype) -> int:
    # f32 -> 8, bf16 -> 16, int8/fp8 -> 32 (packed-sublane layout requirement).
    itemsize = jnp.dtype(dtype).itemsize
    return 8 * max(1, 4 // itemsize)


def _make_mixloss_kernel(inv_n_val, inv_batch, batch, tile_b, inner, ragged):
    inv_n_val = float(inv_n_val)
    inv_batch = float(inv_batch)
    batch = int(batch)
    tile_b = int(tile_b)
    inner = int(inner)

    def kernel(pp_ref, lp_ref, pv_ref, lv_ref, out_ref, acc_ref, sse_ref):
        c = pl.program_id(0)   # "parallel" core-split axis
        i = pl.program_id(1)   # "arbitrary" reduction axis

        # --- per-core init: zero the lane-wise accumulator and the SSE slot ---
        @pl.when(i == 0)
        def _init():
            acc_ref[...] = jnp.zeros_like(acc_ref)
            sse_ref[0] = jnp.float32(0.0)

        # --- value term: computed exactly once, only on core 0's first step ---
        @pl.when((c == 0) & (i == 0))
        def _value():
            dv = lv_ref[...].astype(jnp.float32) - pv_ref[...].astype(jnp.float32)
            sse_ref[0] = jnp.sum(dv * dv)

        # --- per-tile policy contribution (cast per tile, accumulate in f32) ---
        pp = pp_ref[...].astype(jnp.float32)
        lp = lp_ref[...].astype(jnp.float32)
        contrib = jnp.log(pp) * lp
        if ragged:
            # Mask AFTER log*mul: padding rows may hold garbage (log -> NaN/Inf)
            # but jnp.where is a select, so masked-out lanes contribute exactly 0.
            rows = jax.lax.broadcasted_iota(jnp.int32, contrib.shape, 0)
            limit = batch - (c * inner + i) * tile_b
            contrib = jnp.where(rows < limit, contrib, 0.0)
        # Lane-wise partial sum into VMEM: no cross-lane reduce / SMEM round-trip
        # on the per-step critical path.
        acc_ref[...] += jnp.sum(contrib, axis=0, keepdims=True)

        # --- finalize per core: one full reduce, normalize, emit partial ---
        @pl.when(i == pl.num_programs(1) - 1)
        def _finalize():
            partial = sse_ref[0] * inv_n_val - jnp.sum(acc_ref[...]) * inv_batch
            out_ref[...] = jnp.full(out_ref.shape, partial, dtype=out_ref.dtype)

    return kernel


def mix_loss(pred_policy, label_policy, pred_value, label_value, *,
             tile_rows=None, target_block_bytes=_DEFAULT_BLOCK_BYTES):
    """Pallas implementation of MixLoss.forward.

    pred_policy, label_policy : (B, C) — consumed in their storage dtype
                                (pass bf16 to halve HBM traffic; accumulation
                                is always f32 in-kernel).
    pred_value                : any shape with the same element count as label_value
    label_value               : (B,) or (B, 1)
    Returns a scalar f32.
    """
    if pred_policy.ndim != 2 or label_policy.ndim != 2:
        raise ValueError("policy tensors must be rank-2 (batch, classes)")

    B, C = (int(pred_policy.shape[0]), int(pred_policy.shape[1]))
    n_val = int(label_value.size)              # MSE mean denominator (true size)

    # view_as(labelValue) == reshape; flatten both to a tiny lane-dense row.
    pv2 = jnp.reshape(pred_value, (1, n_val))
    lv2 = jnp.reshape(label_value, (1, n_val))

    # ---- tile-size selection (no host repack: tile the batch dim directly) ----
    sub = max(_sublane_multiple(pred_policy.dtype), _sublane_multiple(label_policy.dtype))
    itemsize = jnp.dtype(pred_policy.dtype).itemsize
    c_pad = -(-C // _LANES) * _LANES                 # lane-padded VMEM row width
    bytes_per_row = c_pad * itemsize
    if tile_rows is None:
        tile_rows = max(sub, (int(target_block_bytes) // bytes_per_row) // sub * sub)
    else:
        tile_rows = max(sub, -(-int(tile_rows) // sub) * sub)
    tile_b = B if tile_rows >= B else tile_rows       # full-dim block needs no alignment

    total_blocks = -(-B // tile_b)
    split = 2 if total_blocks >= 2 else 1             # 2-way split feeds both v7x TCs
    inner = -(-total_blocks // split)
    ragged = (split * inner * tile_b) != B            # tail rows and/or duplicated block

    def policy_map(c, i):
        # Clamp so the (at most one) overflow step re-reads the last valid block;
        # its contribution is masked to zero in the kernel.
        return (jnp.minimum(c * inner + i, total_blocks - 1), 0)

    kernel = _make_mixloss_kernel(1.0 / n_val, 1.0 / B, B, tile_b, inner, ragged)

    bytes_accessed = (B * C * itemsize
                      + B * C * jnp.dtype(label_policy.dtype).itemsize
                      + n_val * jnp.dtype(pv2.dtype).itemsize
                      + n_val * jnp.dtype(lv2.dtype).itemsize
                      + split * 8 * _LANES * 4)

    out = pl.pallas_call(
        kernel,
        out_shape=jax.ShapeDtypeStruct((split, 8, _LANES), jnp.float32),
        grid_spec=pltpu.PrefetchScalarGridSpec(
            num_scalar_prefetch=0,
            grid=(split, inner),
            in_specs=[
                pl.BlockSpec((tile_b, C), policy_map),          # predPolicy tiles
                pl.BlockSpec((tile_b, C), policy_map),          # labelPolicy tiles
                pl.BlockSpec((1, n_val), lambda c, i: (0, 0)),  # predValue (resident)
                pl.BlockSpec((1, n_val), lambda c, i: (0, 0)),  # labelValue (resident)
            ],
            out_specs=pl.BlockSpec((1, 8, _LANES), lambda c, i: (c, 0, 0)),
            scratch_shapes=[
                pltpu.VMEM((1, C), jnp.float32),   # lane-wise policy accumulator
                pltpu.SMEM((1,), jnp.float32),     # value-term SSE
            ],
        ),
        compiler_params=pltpu.CompilerParams(
            dimension_semantics=("parallel", "arbitrary"),
            vmem_limit_bytes=_VMEM_LIMIT_BYTES,
        ),
        cost_estimate=pl.CostEstimate(
            flops=2 * B * C + 3 * n_val,
            transcendentals=B * C,
            bytes_accessed=int(bytes_accessed),
        ),
    )(pred_policy, label_policy, pv2, lv2)

    # Combine the per-core partials (core 1's partial has no value term).
    return jnp.sum(out[:, 0, 0])


def mix_loss_ref(pred_policy, label_policy, pred_value, label_value):
    pp = pred_policy.astype(jnp.float32)
    lp = label_policy.astype(jnp.float32)
    pv = jnp.reshape(pred_value, jnp.shape(label_value)).astype(jnp.float32)
    lv = label_value.astype(jnp.float32)
    value_loss = jnp.mean((lv - pv) ** 2)
    policy_loss = jnp.mean(jnp.sum(jnp.log(pp) * lp, axis=1))
    return value_loss - policy_loss


if __name__ == "__main__":
    root = jax.random.PRNGKey(0)

    def make_inputs(key, B, C, dtype=jnp.float32):
        k1, k2, k3, k4 = jax.random.split(key, 4)
        pp = jax.nn.softmax(jax.random.normal(k1, (B, C), jnp.float32), axis=1).astype(dtype)
        lp = jax.nn.softmax(jax.random.normal(k2, (B, C), jnp.float32), axis=1).astype(dtype)
        pv = jax.random.uniform(k3, (B, 1), jnp.float32, -1.0, 1.0)
        lv = jax.random.uniform(k4, (B,), jnp.float32, -1.0, 1.0)
        return pp, lp, pv, lv

    keys = jax.random.split(root, 4)

    # 1) module's natural small shape: single block, grid (1, 1)
    pp, lp, pv, lv = make_inputs(keys[0], 8, 32)
    out = jax.block_until_ready(mix_loss(pp, lp, pv, lv))
    ref = mix_loss_ref(pp, lp, pv, lv)
    assert jnp.allclose(out, ref, rtol=1e-5, atol=1e-5), (out, ref)

    # 2) even 2-way split across the parallel axis, grid (2, 1)
    pp, lp, pv, lv = make_inputs(keys[1], 16, 100)
    out = jax.block_until_ready(mix_loss(pp, lp, pv, lv, tile_rows=8))
    ref = mix_loss_ref(pp, lp, pv, lv)
    assert jnp.allclose(out, ref, rtol=1e-5, atol=1e-5), (out, ref)

    # 3) ragged tail + clamped duplicate block, grid (2, 2) with in-kernel mask
    pp, lp, pv, lv = make_inputs(keys[2], 20, 100)
    out = jax.block_until_ready(mix_loss(pp, lp, pv, lv, tile_rows=8))
    ref = mix_loss_ref(pp, lp, pv, lv)
    assert jnp.allclose(out, ref, rtol=1e-5, atol=1e-5), (out, ref)

    # 4) bf16 policy inputs (halved HBM traffic), grid (2, 2)
    pp, lp, pv, lv = make_inputs(keys[3], 64, 128, dtype=jnp.bfloat16)
    out = jax.block_until_ready(mix_loss(pp, lp, pv, lv, tile_rows=16))
    ref = mix_loss_ref(pp, lp, pv, lv)
    assert jnp.allclose(out, ref, rtol=1e-5, atol=1e-5), (out, ref)

    print("KERNEL_OK")
</pallas_src>

<mosaic_0001>
module attributes {stable_mosaic.version = 11 : i64} {
  func.func @kernel(%arg0: i32, %arg1: i32, %arg2: memref<8x32xf32, #tpu.memory_space<vmem>>, %arg3: memref<8x32xf32, #tpu.memory_space<vmem>>, %arg4: memref<1x8xf32, #tpu.memory_space<vmem>>, %arg5: memref<1x8xf32, #tpu.memory_space<vmem>>, %arg6: memref<1x8x128xf32, #tpu.memory_space<vmem>>, %arg7: memref<1x32xf32, #tpu.memory_space<vmem>>, %arg8: memref<1xf32, #tpu.memory_space<smem>>) attributes {dimension_semantics = [#tpu.dimension_semantics<parallel>, #tpu.dimension_semantics<arbitrary>], iteration_bounds = array<i64: 1, 1>, scalar_prefetch = 0 : i64, scratch_operands = 2 : i64, tpu.core_type = #tpu.core_type<tc>, window_params = [{transform_indices = @transform_0, window_bounds = array<i64: 8, 32>}, {transform_indices = @transform_1, window_bounds = array<i64: 8, 32>}, {pipeline_mode = #tpu.pipeline_mode<synchronous>, transform_indices = @transform_2, window_bounds = array<i64: 1, 8>}, {pipeline_mode = #tpu.pipeline_mode<synchronous>, transform_indices = @transform_3, window_bounds = array<i64: 1, 8>}, {transform_indices = @transform_4, window_bounds = array<i64: 1, 8, 128>}]} {
    %c0_i32 = arith.constant 0 : i32
    %0 = arith.cmpi eq, %arg1, %c0_i32 : i32
    %1 = arith.extui %0 : i1 to i32
    %c0_i32_0 = arith.constant 0 : i32
    %2 = arith.cmpi ne, %1, %c0_i32_0 : i32
    scf.if %2 {
      %cst_13 = arith.constant 0.000000e+00 : f32
      %20 = vector.broadcast %cst_13 : f32 to vector<1x32xf32>
      %c0_14 = arith.constant 0 : index
      %c0_15 = arith.constant 0 : index
      %21 = vector.load %arg7[%c0_14, %c0_15] : memref<1x32xf32, #tpu.memory_space<vmem>>, vector<1x32xf32>
      tpu.vector_store %arg7[%c0_14, %c0_15], %20 {strides = array<i32>} : memref<1x32xf32, #tpu.memory_space<vmem>>, vector<1x32xf32>,
      %cst_16 = arith.constant 0.000000e+00 : f32
      %c0_17 = arith.constant 0 : index
      %22 = memref.load %arg8[%c0_17] : memref<1xf32, #tpu.memory_space<smem>>
      memref.store %cst_16, %arg8[%c0_17] : memref<1xf32, #tpu.memory_space<smem>>
    } else {
    }
    %c0_i32_1 = arith.constant 0 : i32
    %3 = arith.cmpi eq, %arg0, %c0_i32_1 : i32
    %c0_i32_2 = arith.constant 0 : i32
    %4 = arith.cmpi eq, %arg1, %c0_i32_2 : i32
    %5 = arith.andi %3, %4 : i1
    %6 = arith.extui %5 : i1 to i32
    %c0_i32_3 = arith.constant 0 : i32
    %7 = arith.cmpi ne, %6, %c0_i32_3 : i32
    scf.if %7 {
      %c0_13 = arith.constant 0 : index
      %c0_14 = arith.constant 0 : index
      %20 = vector.load %arg5[%c0_13, %c0_14] : memref<1x8xf32, #tpu.memory_space<vmem>>, vector<1x8xf32>
      %c0_15 = arith.constant 0 : index
      %c0_16 = arith.constant 0 : index
      %21 = vector.load %arg4[%c0_15, %c0_16] : memref<1x8xf32, #tpu.memory_space<vmem>>, vector<1x8xf32>
      %22 = arith.subf %20, %21 : vector<1x8xf32>
      %23 = arith.mulf %22, %22 : vector<1x8xf32>
      %24 = vector.shape_cast %23 : vector<1x8xf32> to vector<1x1x8xf32>
      %cst_17 = arith.constant dense<0.000000e+00> : vector<1xf32>
      %25 = vector.multi_reduction <add>, %24, %cst_17 [1, 2] : vector<1x1x8xf32> to vector<1xf32>
      %26 = vector.shape_cast %25 : vector<1xf32> to vector<1x1x1xf32>
      %27 = vector.extract %26[0, 0, 0] : f32 from vector<1x1x1xf32>
      %c0_18 = arith.constant 0 : index
      %28 = memref.load %arg8[%c0_18] : memref<1xf32, #tpu.memory_space<smem>>
      memref.store %27, %arg8[%c0_18] : memref<1xf32, #tpu.memory_space<smem>>
    } else {
    }
    %c0 = arith.constant 0 : index
    %c0_4 = arith.constant 0 : index
    %8 = vector.load %arg2[%c0, %c0_4] : memref<8x32xf32, #tpu.memory_space<vmem>>, vector<8x32xf32>
    %c0_5 = arith.constant 0 : index
    %c0_6 = arith.constant 0 : index
    %9 = vector.load %arg3[%c0_5, %c0_6] : memref<8x32xf32, #tpu.memory_space<vmem>>, vector<8x32xf32>
    %10 = math.log %8 : vector<8x32xf32>
    %11 = arith.mulf %10, %9 : vector<8x32xf32>
    %c0_7 = arith.constant 0 : index
    %c0_8 = arith.constant 0 : index
    %12 = vector.load %arg7[%c0_7, %c0_8] : memref<1x32xf32, #tpu.memory_space<vmem>>, vector<1x32xf32>
    %cst = arith.constant dense<0.000000e+00> : vector<32xf32>
    %13 = vector.multi_reduction <add>, %11, %cst [0] : vector<8x32xf32> to vector<32xf32>
    %14 = vector.shape_cast %13 : vector<32xf32> to vector<1x32xf32>
    %15 = arith.addf %12, %14 : vector<1x32xf32>
    %c0_9 = arith.constant 0 : index
    %c0_10 = arith.constant 0 : index
    %16 = vector.load %arg7[%c0_9, %c0_10] : memref<1x32xf32, #tpu.memory_space<vmem>>, vector<1x32xf32>
    tpu.vector_store %arg7[%c0_9, %c0_10], %15 {strides = array<i32>} : memref<1x32xf32, #tpu.memory_space<vmem>>, vector<1x32xf32>,
    %c0_i32_11 = arith.constant 0 : i32
    %17 = arith.cmpi eq, %arg1, %c0_i32_11 : i32
    %18 = arith.extui %17 : i1 to i32
    %c0_i32_12 = arith.constant 0 : i32
    %19 = arith.cmpi ne, %18, %c0_i32_12 : i32
    scf.if %19 {
      %c0_13 = arith.constant 0 : index
      %20 = memref.load %arg8[%c0_13] : memref<1xf32, #tpu.memory_space<smem>>
      %cst_14 = arith.constant 1.250000e-01 : f32
      %21 = arith.mulf %20, %cst_14 : f32
      %c0_15 = arith.constant 0 : index
      %c0_16 = arith.constant 0 : index
      %22 = vector.load %arg7[%c0_15, %c0_16] : memref<1x32xf32, #tpu.memory_space<vmem>>, vector<1x32xf32>
      %23 = vector.shape_cast %22 : vector<1x32xf32> to vector<1x1x32xf32>
      %cst_17 = arith.constant dense<0.000000e+00> : vector<1xf32>
      %24 = vector.multi_reduction <add>, %23, %cst_17 [1, 2] : vector<1x1x32xf32> to vector<1xf32>
      %25 = vector.shape_cast %24 : vector<1xf32> to vector<1x1x1xf32>
      %26 = vector.extract %25[0, 0, 0] : f32 from vector<1x1x1xf32>
      %cst_18 = arith.constant 1.250000e-01 : f32
      %27 = arith.mulf %26, %cst_18 : f32
      %28 = arith.subf %21, %27 : f32
      %29 = vector.broadcast %28 : f32 to vector<1x8x128xf32>
      %c0_19 = arith.constant 0 : index
      %c0_20 = arith.constant 0 : index
      %c0_21 = arith.constant 0 : index
      %30 = vector.load %arg6[%c0_19, %c0_20, %c0_21] : memref<1x8x128xf32, #tpu.memory_space<vmem>>, vector<1x8x128xf32>
      tpu.vector_store %arg6[%c0_19, %c0_20, %c0_21], %29 {strides = array<i32>} : memref<1x8x128xf32, #tpu.memory_space<vmem>>, vector<1x8x128xf32>,
    } else {
    }
    return
  }
  func.func @transform_0(%arg0: i32, %arg1: i32) -> (i32, i32) {
    %c1_i32 = arith.constant 1 : i32
    %0 = arith.muli %arg0, %c1_i32 : i32
    %1 = arith.addi %0, %arg1 : i32
    %c0_i32 = arith.constant 0 : i32
    %2 = arith.minsi %1, %c0_i32 : i32
    %c0_i32_0 = arith.constant 0 : i32
    %c0_i32_1 = arith.constant 0 : i32
    return %2, %c0_i32_0 : i32, i32
  }
  func.func @transform_1(%arg0: i32, %arg1: i32) -> (i32, i32) {
    %c1_i32 = arith.constant 1 : i32
    %0 = arith.muli %arg0, %c1_i32 : i32
    %1 = arith.addi %0, %arg1 : i32
    %c0_i32 = arith.constant 0 : i32
    %2 = arith.minsi %1, %c0_i32 : i32
    %c0_i32_0 = arith.constant 0 : i32
    %c0_i32_1 = arith.constant 0 : i32
    return %2, %c0_i32_0 : i32, i32
  }
  func.func @transform_2(%arg0: i32, %arg1: i32) -> (i32, i32) {
    %c0_i32 = arith.constant 0 : i32
    %c0_i32_0 = arith.constant 0 : i32
    %c0_i32_1 = arith.constant 0 : i32
    return %c0_i32, %c0_i32_0 : i32, i32
  }
  func.func @transform_3(%arg0: i32, %arg1: i32) -> (i32, i32) {
    %c0_i32 = arith.constant 0 : i32
    %c0_i32_0 = arith.constant 0 : i32
    %c0_i32_1 = arith.constant 0 : i32
    return %c0_i32, %c0_i32_0 : i32, i32
  }
  func.func @transform_4(%arg0: i32, %arg1: i32) -> (i32, i32, i32) {
    %c0_i32 = arith.constant 0 : i32
    %c0_i32_0 = arith.constant 0 : i32
    %c0_i32_1 = arith.constant 0 : i32
    return %arg0, %c0_i32, %c0_i32_0 : i32, i32, i32
  }
}

</mosaic_0001>

<bundles_post_ra>
// kernel: tpu_custom_call.1
= control target key start
LH: loop header
LB: loop body
LE: loop exit
PB: predicated region body
PF: predicated region fallthrough
CT: control target
= control target key end

     0   :  { %9 = vsyncpa [#allocation5], 0  ;;  %s268_s0 = inlined_call_operand.hbm [shape: f32[8,32], index: 0, kind: input, shape index: {}]   ;;  %s269_s1 = inlined_call_operand.hbm [shape: f32[8,32], index: 1, kind: input, shape index: {}]   ;;  %s270_s2 = inlined_call_operand.vmem [shape: f32[1,8], index: 2, kind: input, shape index: {}]   ;;  %s271_s3 = inlined_call_operand.vmem [shape: f32[1,8], index: 3, kind: input, shape index: {}]   ;;  %s272_s4 = inlined_call_operand.hbm [shape: f32[1,8,128], index: 4, kind: output, shape index: {}]  }
   0x1   :  { %10 = vsyncpa [#allocation8], 0 }
   0x2   :  { %11 = vsyncpa [#allocation6], 0  ;;  %s221_s15 = smov [#allocation4]   ;;  %s222_s17 = smov [#allocation7]  }
   0x3   :  { %s23_s16 = sshll.u32 %s221_s15, 4  ;;  %s38_s18 = sshll.u32 %s222_s17, 4  ;;  %s24_s16 = int_to_ptr.vmem [resolvable:$true] %s23_s16  ;;  %s39_s18 = int_to_ptr.vmem [resolvable:$true] %s38_s18 }
   0x4   :  { %s163_s19 = scalar_lea.vmem %s24_s16, 128  ;;  %p168_p1 = scmp.lt.s32.totalorder %s24_s16, %s24_s16 }
   0x5   :  { %p164_p0 = scmp.ne.s32.totalorder %s24_s16, %s163_s19  ;;  %p169_p2 = scmp.lt.s32.totalorder %s163_s19, %s163_s19 }
   0x7   :  { %p170_p3 = por %p169_p2, %p168_p1 }
   0x9   :  { %p171_p4 = pnand %p170_p3, %p164_p0 }
   0xb   :  { %174 = shalt.err (!%p171_p4)
}
   0xc   :  { %26 = dma.hbm_to_vmem [thread:$0]  %s268_s0, 128, %s24_s16, [#allocation5]  }
   0xd   :  { %s183_s22 = scalar_lea.vmem %s39_s18, 128  ;;  %p188_p6 = scmp.lt.s32.totalorder %s39_s18, %s39_s18 }
   0xe   :  { %p184_p5 = scmp.ne.s32.totalorder %s39_s18, %s183_s22  ;;  %p189_p7 = scmp.lt.s32.totalorder %s183_s22, %s183_s22 }
  0x10   :  { %p190_p8 = por %p189_p7, %p188_p6 }
  0x12   :  { %p191_p9 = pnand %p190_p8, %p184_p5 }
  0x14   :  { %194 = shalt.err (!%p191_p9)
}
  0x15   :  { %41 = dma.hbm_to_vmem [thread:$0]  %s269_s1, 128, %s39_s18, [#allocation8]  }
  0x16   :  { %215 = dma.done.wait [#allocation5], 128  }
  0x17   :  { %216 = vsyncadd [#allocation5], 4294967168 }
  0x18   :  { %217 = dma.done.wait [#allocation8], 128  }
  0x19   :  { %218 = vsyncadd [#allocation8], 4294967168  ;;  %vm62_vm0 = vcmask 253952   ;;  %v223_v0 = vmov 0.0   ;;  %v71_v1 = vld [vmem:[%s271_s3] sm:$0x1] }
  0x1a   :  { %63 = vst.msk [vmem:[#allocation2] sm:$0x1] %vm62_vm0, %v223_v0  ;;  %v72_v2 = vld [vmem:[%s270_s2] sm:$0x1]  ;;  %v88_v3 = vld [vmem:[#allocation4] sm:$0xff]  ;;  %vm75_vm1 = vcmask 57344  }
  0x1b   :  { %v73_v4 = vsub.f32 %v71_v1, %v72_v2  ;;  %153 = vlog2.f32 %v88_v3  ;;  %v89_v8 = vld [vmem:[#allocation7] sm:$0xff]  ;;  %vm94_vm2 = vcmask 261120   ;;  %s224_s29 = smov [#allocation9]  }
  0x1c   :  { %s131_s30 = sshll.u32 %s224_s29, 4  ;;  %s132_s30 = int_to_ptr.vmem [resolvable:$true] %s131_s30 }
  0x1d   :  { %v74_v5 = vmul.f32 %v73_v4, %v73_v4  ;;  %s195_s6 = scalar_lea.vmem %s132_s30, 128  ;;  %p200_p11 = scmp.lt.s32.totalorder %s132_s30, %s132_s30 }
  0x1e   :  { %p196_p10 = scmp.ne.s32.totalorder %s132_s30, %s195_s6  ;;  %p201_p12 = scmp.lt.s32.totalorder %s195_s6, %s195_s6 }
  0x1f   :  { %v76_v6 = vsel %vm75_vm1, %v74_v5, 0.0 }
  0x20   :  { %77 = vadd.xlane.f32.xlu0 %v76_v6  ;;  %p202_p13 = por %p201_p12, %p200_p11 }
  0x21   :  { %v93_v17 = vld [vmem:[#allocation2] sm:$0x1] }
  0x22   :  { %p203_p0 = pnand %p202_p13, %p196_p10 }
  0x28   :  { %v154_v7 = vpop.eup %153 }
  0x29   :  { %v91_v9 = vmul.f32 0.6931472, %v154_v7 }
  0x2b   :  { %v92_v10 = vmul.f32 %v91_v9, %v89_v8 }
  0x2d   :  { %v95_v11 = vsel %vm94_vm2, %v92_v10, 0.0 }
  0x2e   :  { %v96_v12 = vrot.slane %v95_v11, 4 }
  0x30   :  { %v97_v13 = vadd.f32 %v96_v12, %v95_v11 }
  0x32   :  { %v98_v14 = vrot.slane %v97_v13, 2 }
  0x34   :  { %v99_v15 = vadd.f32 %v98_v14, %v97_v13 }
  0x36   :  { %v100_v16 = vrot.slane %v99_v15, 1 }
  0x38   :  { %v101_v18 = vadd.f32 %v100_v16, %v99_v15 }
  0x3a   :  { %v102_v19 = vadd.f32 %v101_v18, %v93_v17 }
  0x3c   :  { %104 = vst.msk [vmem:[#allocation2] sm:$0x1] %vm62_vm0, %v102_v19 }
  0x43   :  { %v110_v20 = vld [vmem:[#allocation2] sm:$0x1] }
  0x44   :  { %v111_v21 = vsel %vm62_vm0, %v110_v20, 0.0 }
  0x45   :  { %112 = vadd.xlane.f32.xlu0 %v111_v21 }
  0xa9   :  { %v78_v22 = vpop.xlane.xlu0 %77 }
  0xaa   :  { %v79_v23 = vrot.slane %v78_v22, 4 }
  0xac   :  { %v80_v24 = vadd.f32 %v79_v23, %v78_v22 }
  0xae   :  { %v81_v25 = vrot.slane %v80_v24, 2 }
  0xb0   :  { %v82_v26 = vadd.f32 %v81_v25, %v80_v24 }
  0xb2   :  { %v83_v27 = vrot.slane %v82_v26, 1 }
  0xb4   :  { %v84_v28 = vadd.f32 %v83_v27, %v82_v26 }
  0xb6   :  { %145 = vpush %v84_v28 }
  0xce   :  { %v113_v29 = vpop.xlane.xlu0 %112 }
  0xcf   :  { %v114_v30 = vrot.slane %v113_v29, 4 }
  0xd1   :  { %v115_v31 = vadd.f32 %v114_v30, %v113_v29 }
  0xd3   :  { %v116_v32 = vrot.slane %v115_v31, 2 }
  0xd5   :  { %v117_v33 = vadd.f32 %v116_v32, %v115_v31 }
  0xd7   :  { %v118_v34 = vrot.slane %v117_v33, 1 }
  0xd9   :  { %v119_v35 = vadd.f32 %v118_v34, %v117_v33 }
  0xdb   :  { %147 = vpush %v119_v35 }
  0xe7   :  { %s146_s1 = spop %145 }
  0xe8   :  { %s109_s2 = smul.f32 0.125, %s146_s1 }
 0x10c   :  { %s148_s3 = spop %147 }
 0x10d   :  { %s121_s28 = smul.f32 0.125, %s148_s3 }
 0x10f   :  { %s122_s5 = ssub.f32 %s109_s2, %s121_s28 }
 0x111   :  { %v123_v36 = vstv %s122_s5 }
 0x112   :  { %124 = vst [vmem:[#allocation9] sm:$0xff] %v123_v36 }
 0x113   :  { %206 = shalt.err (!%p203_p0)
}
 0x114   :  { %134 = dma.vmem_to_hbm [thread:$0]  %s132_s30, 128, %s272_s4, [#allocation6]  }
 0x115   :  { %219 = dma.done.wait [#allocation6], 128  }
 0x116   :  { %220 = vsyncadd [#allocation6], 4294967168 }
 0x117   :  { %138 = vsyncpa [#allocation5], 1 }
 0x118   :  { %139 = vsyncpa [#allocation8], 1 }
 0x119   :  { %140 = vsyncpa [#allocation6], 1 }

</bundles_post_ra>
